<compile_context>
chip_gen: v5e
topology: v5e:2x2
jax: 0.10.0
libtpu: 0.0.40
codegen_flags: <defaults>
</compile_context>

<pallas_src>
import jax
import jax.numpy as jnp
from jax.experimental import pallas as pl
from jax.experimental.pallas import tpu as pltpu


def _matmul_kernel(x_ref, w_ref, o_ref):
    # One (TILE_M, P) x (P, E_pad) -> (TILE_M, E_pad) MXU matmul per grid step.
    o_ref[...] = jnp.dot(
        x_ref[...], w_ref[...], preferred_element_type=jnp.float32
    ).astype(o_ref.dtype)


def _round_up(x: int, n: int) -> int:
    return ((x + n - 1) // n) * n


def multi_label_embedding(
    input_ids: jax.Array, weight: jax.Array, *, tile_m: int = 512
) -> jax.Array:
    """Pallas equivalent of MultiLabelEmbedding.forward (out = input_ids @ weight)."""
    num_positions, embedding_dim = weight.shape
    orig_shape = input_ids.shape
    assert orig_shape[-1] == num_positions

    # Flatten all leading dims into M (glue, plain JAX).
    m = 1
    for d in orig_shape[:-1]:
        m *= d
    x2d = input_ids.reshape(m, num_positions)

    # Lane-dense output: pad E to a multiple of 128 so stores are unmasked.
    e_pad = _round_up(embedding_dim, 128)
    if e_pad != embedding_dim:
        weight = jnp.pad(weight, ((0, 0), (0, e_pad - embedding_dim)))

    # Row tile: multiple of 8 (sublane), capped at `tile_m`; pad M so the grid
    # divides evenly and every block satisfies the (8,128) rule.
    tm = min(tile_m, _round_up(m, 8))
    m_pad = _round_up(m, tm)
    if m_pad != m:
        x2d = jnp.pad(x2d, ((0, m_pad - m), (0, 0)))

    grid = (m_pad // tm,)

    out2d = pl.pallas_call(
        _matmul_kernel,
        out_shape=jax.ShapeDtypeStruct((m_pad, e_pad), input_ids.dtype),
        grid=grid,
        in_specs=[
            # Input rows stream per grid step (double-buffered).
            pl.BlockSpec((tm, num_positions), lambda i: (i, 0)),
            # Weight block index is constant -> stays resident in VMEM.
            pl.BlockSpec((num_positions, e_pad), lambda i: (0, 0)),
        ],
        out_specs=pl.BlockSpec((tm, e_pad), lambda i: (i, 0)),
        compiler_params=pltpu.CompilerParams(
            dimension_semantics=("parallel",),
        ),
    )(x2d, weight)

    # Drop the M / E padding and restore the original leading dims.
    out2d = out2d[:m, :embedding_dim]
    return out2d.reshape(*orig_shape[:-1], embedding_dim)


if __name__ == "__main__":
    key = jax.random.PRNGKey(0)
    k_w, k_x = jax.random.split(key)

    batch, seq = 2, 8
    num_positions, embedding_dim = 16, 32

    # Deterministic parameter init (nn.init.normal_ -> standard normal).
    weight = jax.random.normal(k_w, (num_positions, embedding_dim), dtype=jnp.float32)

    # Multi-hot style float input over positions.
    input_ids = jax.random.bernoulli(k_x, 0.3, (batch, seq, num_positions)).astype(
        jnp.float32
    )

    out = multi_label_embedding(input_ids, weight)
    out = jax.block_until_ready(out)

    # Sanity check against plain JAX reference.
    ref = jnp.matmul(input_ids, weight)
    assert out.shape == (batch, seq, embedding_dim)
    assert jnp.allclose(out, ref, atol=1e-5, rtol=1e-5)

    print("KERNEL_OK")
</pallas_src>

<mosaic_0001>
module attributes {stable_mosaic.version = 11 : i64} {
  func.func @_matmul_kernel(%arg0: i32, %arg1: memref<16x16xf32, #tpu.memory_space<vmem>>, %arg2: memref<16x128xf32, #tpu.memory_space<vmem>>, %arg3: memref<16x128xf32, #tpu.memory_space<vmem>>) attributes {dimension_semantics = [#tpu.dimension_semantics<parallel>], iteration_bounds = array<i64: 1>, scalar_prefetch = 0 : i64, scratch_operands = 0 : i64, tpu.core_type = #tpu.core_type<tc>, window_params = [{transform_indices = @transform_0, window_bounds = array<i64: 16, 16>}, {pipeline_mode = #tpu.pipeline_mode<synchronous>, transform_indices = @transform_1, window_bounds = array<i64: 16, 128>}, {transform_indices = @transform_2, window_bounds = array<i64: 16, 128>}]} {
    %c0 = arith.constant 0 : index
    %c0_0 = arith.constant 0 : index
    %0 = vector.load %arg1[%c0, %c0_0] : memref<16x16xf32, #tpu.memory_space<vmem>>, vector<16x16xf32>
    %c0_1 = arith.constant 0 : index
    %c0_2 = arith.constant 0 : index
    %1 = vector.load %arg2[%c0_1, %c0_2] : memref<16x128xf32, #tpu.memory_space<vmem>>, vector<16x128xf32>
    %cst = arith.constant dense<0.000000e+00> : vector<16x128xf32>
    %2 = tpu.matmul %0, %1, %cst {dimension_numbers = #tpu.dot_dimension_numbers<[1], [0], [0], [1], [0, 0, 1, 1], [], []>} : vector<16x16xf32>, vector<16x128xf32>, vector<16x128xf32> -> vector<16x128xf32>
    %c0_3 = arith.constant 0 : index
    %c0_4 = arith.constant 0 : index
    %3 = vector.load %arg3[%c0_3, %c0_4] : memref<16x128xf32, #tpu.memory_space<vmem>>, vector<16x128xf32>
    tpu.vector_store %arg3[%c0_3, %c0_4], %2 {strides = array<i32>} : memref<16x128xf32, #tpu.memory_space<vmem>>, vector<16x128xf32>,
    return
  }
  func.func @transform_0(%arg0: i32) -> (i32, i32) {
    %c0_i32 = arith.constant 0 : i32
    %c0_i32_0 = arith.constant 0 : i32
    return %arg0, %c0_i32 : i32, i32
  }
  func.func @transform_1(%arg0: i32) -> (i32, i32) {
    %c0_i32 = arith.constant 0 : i32
    %c0_i32_0 = arith.constant 0 : i32
    %c0_i32_1 = arith.constant 0 : i32
    return %c0_i32, %c0_i32_0 : i32, i32
  }
  func.func @transform_2(%arg0: i32) -> (i32, i32) {
    %c0_i32 = arith.constant 0 : i32
    %c0_i32_0 = arith.constant 0 : i32
    return %arg0, %c0_i32 : i32, i32
  }
}

</mosaic_0001>

<bundles_post_ra>
// kernel: tpu_custom_call.1
= control target key start
LH: loop header
LB: loop body
LE: loop exit
PB: predicated region body
PF: predicated region fallthrough
CT: control target
= control target key end

     0   :  { %7 = vsyncpa [#allocation3], 0  ;;  %s225_s0 = inlined_call_operand.hbm [shape: f32[16,16], index: 0, kind: input, shape index: {}]   ;;  %s226_s1 = inlined_call_operand.hbm [shape: f32[16,128], index: 1, kind: input, shape index: {}]   ;;  %s227_s2 = inlined_call_operand.hbm [shape: f32[16,128], index: 2, kind: output, shape index: {}]  }
   0x1   :  { %8 = vsyncpa [#allocation6], 0 }
   0x2   :  { %9 = vsyncpa [#allocation4], 0  ;;  %s14_s11 = sshll.u32 %s225_s0, 4  ;;  %s187_s12 = smov [#allocation2]   ;;  %s15_s11 = int_to_ptr.hbm [resolvable:$true] %s14_s11 }
   0x3   :  { %s16_s13 = sshll.u32 %s187_s12, 4  ;;  %s27_s16 = sshll.u32 %s226_s1, 4  ;;  %s17_s13 = int_to_ptr.vmem [resolvable:$true] %s16_s13  ;;  %s28_s16 = int_to_ptr.hbm [resolvable:$true] %s27_s16 }
   0x4   :  { %s188_s17 = smov 128   ;;  %s189_s18 = smov 8  }
   0x5   :  { %22 = dma.hbm_to_vmem [thread:$0]  %s15_s11, 256, %s17_s13, [#allocation3], %s188_s17, %s188_s17, %s189_s18  }
   0x6   :  { %s190_s19 = smov [#allocation5]  }
   0x7   :  { %s29_s20 = sshll.u32 %s190_s19, 4  ;;  %s30_s20 = int_to_ptr.vmem [resolvable:$true] %s29_s20 }
   0x8   :  { %35 = dma.hbm_to_vmem [thread:$0]  %s28_s16, 256, %s30_s20, [#allocation6], %s188_s17, %s188_s17, %s189_s18  }
   0x9   :  { %181 = dma.done.wait [#allocation3], 256  }
   0xa   :  { %182 = vsyncadd [#allocation3], 4294967040 }
   0xb   :  { %183 = dma.done.wait [#allocation6], 256  }
   0xc   :  { %184 = vsyncadd [#allocation6], 4294967040  ;;  %v47_v0 = vld [vmem:[#allocation5 + $0x8] sm:$0xff]  ;;  %v46_v1 = vld [vmem:[#allocation5] sm:$0xff]  ;;  %vm48_vm0 = vcmask 130048   ;;  %s191_s0 = smov [#allocation7]  }
   0xd   :  { %69 = vmatpush.msra.mxu0 %v47_v0  ;;  %102 = vmatpush.msra.mxu1 %v47_v0  ;;  %v44_v2 = vld [vmem:[#allocation2] sm:$0xff]  ;;  %v45_v3 = vld [vmem:[#allocation2 + $0x8] sm:$0xff]  ;;  %s84_s1 = sshll.u32 %s191_s0, 4  ;;  %s86_s23 = sshll.u32 %s227_s2, 4  ;;  %s85_s1 = int_to_ptr.vmem [resolvable:$true] %s84_s1  ;;  %s87_s23 = int_to_ptr.hbm [resolvable:$true] %s86_s23 }
   0xf   :  { %70 = vmatpush.msra.mxu0 %v46_v1  ;;  %103 = vmatpush.msra.mxu1 %v46_v1 }
  0x10   :  { %100 = vmatmul.msk.f32.vlgmr.msra.gmra.mxu0 %vm48_vm0, %v44_v2  ;;  %101 = vmatmul.msk.f32.vlgmr.msra.gmra.mxu1 %vm48_vm0, %v45_v3 }
  0x8d   :  { %v72_v4 = vpop.f32.mrf.mxu0  ;;  %v75_v5 = vpop.f32.mrf.mxu1 }
  0x8e   :  { %78 = vst [vmem:[#allocation7] sm:$0xff] %v72_v4 }
  0x8f   :  { %79 = vst [vmem:[#allocation7 + $0x8] sm:$0xff] %v75_v5 }
  0x90   :  { %92 = dma.vmem_to_hbm [thread:$0]  %s85_s1, 256, %s87_s23, [#allocation4], %s188_s17, %s188_s17, %s189_s18  }
  0x91   :  { %185 = dma.done.wait [#allocation4], 256  }
  0x92   :  { %186 = vsyncadd [#allocation4], 4294967040 }
  0x93   :  { %97 = vsyncpa [#allocation3], 1 }
  0x94   :  { %98 = vsyncpa [#allocation6], 1 }
  0x95   :  { %99 = vsyncpa [#allocation4], 1 }

</bundles_post_ra>
